<compile_context>
chip_gen: v6e
topology: v6e:2x2x1
jax: 0.10.0
libtpu: 0.0.40
codegen_flags: <defaults>
</compile_context>

<pallas_src>
import math

import jax
import jax.numpy as jnp
from jax.experimental import pallas as pl
from jax.experimental.pallas import tpu as pltpu

_LANES = 128


def _sublane_pack(dtype) -> int:
    """Native sublane packing: 8 rows (f32), 16 (bf16/f16), 32 (int8/fp8)."""
    return {4: 8, 2: 16, 1: 32}.get(jnp.dtype(dtype).itemsize, 8)


def _max_block_bytes() -> int:
    """Per-block byte budget (2 in + 2 out pipeline buffers stay in VMEM).

    v6e/v7x: 4 MiB blocks -> 16 MiB of buffers < 32 MiB default scoped VMEM.
    v5-class: 3 MiB blocks -> 12 MiB of buffers < 16 MiB default, with headroom.
    """
    try:
        kind = jax.devices()[0].device_kind.lower()
    except Exception:
        kind = ""
    if "v5" in kind:
        return 3 * 1024 * 1024
    return 4 * 1024 * 1024


def _drop_path_kernel(scale_ref, x_ref, o_ref):
    """out = x * scale[n]  (per-sample stochastic-depth scaling).

    scale_ref : SMEM (N,) float32 — per-sample keep-mask / keep_prob
    x_ref     : VMEM lane-dense tile of sample n
    o_ref     : VMEM same-shape output tile
    """
    n = pl.program_id(0)
    s = scale_ref[n].astype(o_ref.dtype)   # native-dtype multiply (bf16 VALU)
    o_ref[...] = x_ref[...] * s


def _call_tiled(x3, scale, ts):
    """x3: (N, S, 128) lane-dense view; ts rows per block (multiple of pack)."""
    N, S, _ = x3.shape
    block = (1, ts, _LANES)
    return pl.pallas_call(
        _drop_path_kernel,
        out_shape=jax.ShapeDtypeStruct(x3.shape, x3.dtype),
        grid_spec=pltpu.PrefetchScalarGridSpec(
            num_scalar_prefetch=1,                 # `scale` -> SMEM
            grid=(N, pl.cdiv(S, ts)),
            in_specs=[pl.BlockSpec(block, lambda n, j, scale: (n, j, 0))],
            out_specs=pl.BlockSpec(block, lambda n, j, scale: (n, j, 0)),
        ),
        compiler_params=pltpu.CompilerParams(
            dimension_semantics=("parallel", "parallel")),
    )(scale, x3)


def _call_rows(x3, scale):
    """x3: (N, 1, F) view; one whole sample per grid step (F need not be
    128-aligned — block equals the full trailing dims)."""
    N, _, F = x3.shape
    block = (1, 1, F)
    return pl.pallas_call(
        _drop_path_kernel,
        out_shape=jax.ShapeDtypeStruct(x3.shape, x3.dtype),
        grid_spec=pltpu.PrefetchScalarGridSpec(
            num_scalar_prefetch=1,
            grid=(N,),
            in_specs=[pl.BlockSpec(block, lambda n, scale: (n, 0, 0))],
            out_specs=pl.BlockSpec(block, lambda n, scale: (n, 0, 0)),
        ),
        compiler_params=pltpu.CompilerParams(
            dimension_semantics=("parallel",)),
    )(scale, x3)


def drop_path_pallas(x, key, drop_prob=0.0, training=False):
    """Pallas DropPath forward. x: (N, ...) array. Returns same shape/dtype."""
    if drop_prob == 0.0 or not training:
        return x  # identity path, exactly like the PyTorch module

    keep_prob = 1.0 - drop_prob
    N = x.shape[0]

    # Per-sample Bernoulli(keep_prob) mask, pre-divided by keep_prob so the
    # kernel is a single multiply.  Kept f32 for the SMEM scalar path; cast to
    # x.dtype inside the kernel.
    mask = jax.random.bernoulli(key, p=keep_prob, shape=(N,)).astype(jnp.float32)
    scale = mask / keep_prob if keep_prob > 0.0 else mask

    orig_shape = x.shape
    F = int(math.prod(orig_shape[1:]))          # features per sample (prod(()) == 1)
    pack = _sublane_pack(x.dtype)
    itemsize = jnp.dtype(x.dtype).itemsize
    max_bytes = _max_block_bytes()
    max_rows = max(pack, (max_bytes // (_LANES * itemsize)) // pack * pack)

    if F % (_LANES * pack) == 0:
        # Fast path: already lane/sublane aligned -> no pad, no slice.
        S = F // _LANES
        ts = min(S, max_rows)
        if N == 1 and ts >= S and S >= 2 * pack:
            # v7x megacore: split the single sample so both TCs get a block.
            ts = -(-(S // 2) // pack) * pack
        out = _call_tiled(x.reshape(N, S, _LANES), scale, ts)
        return out.reshape(orig_shape)

    if F * itemsize <= max_bytes:
        # Ragged F, but one whole sample fits in a block: avoid pad/slice HBM
        # round trips entirely (tail lanes handled by masked stores).
        out = _call_rows(x.reshape(N, 1, F), scale)
        return out.reshape(orig_shape)

    # Large *and* unaligned: fall back to padding to a tileable layout.
    S = -(--(-F // _LANES) // pack) * pack if False else -(-(-(-F // _LANES)) // pack) * pack
    S = -(-(-(-F // _LANES)) // pack) * pack   # ceil(ceil(F/128)/pack)*pack
    ts = min(S, max_rows)
    F_pad = S * _LANES
    x_flat = jnp.pad(x.reshape(N, F), ((0, 0), (0, F_pad - F)))
    out = _call_tiled(x_flat.reshape(N, S, _LANES), scale, ts)
    return out.reshape(N, F_pad)[:, :F].reshape(orig_shape)


def drop_path_reference(x, key, drop_prob=0.0, training=False):
    """Pure-JAX reference with identical semantics (same RNG key => same mask)."""
    if drop_prob == 0.0 or not training:
        return x
    keep_prob = 1.0 - drop_prob
    mask = jax.random.bernoulli(key, p=keep_prob, shape=(x.shape[0],)).astype(jnp.float32)
    scale = (mask / keep_prob if keep_prob > 0.0 else mask).astype(x.dtype)
    return x * scale.reshape((x.shape[0],) + (1,) * (x.ndim - 1))


if __name__ == "__main__":
    key = jax.random.PRNGKey(0)
    keys = jax.random.split(key, 8)

    # Primary test: (N, C, H, W) = (2, 4, 16, 16).  F = 1024 -> aligned fast
    # path (no pad / slice), grid (2, 1).
    x = jax.random.normal(keys[0], (2, 4, 16, 16), jnp.float32)
    out = jax.block_until_ready(drop_path_pallas(x, keys[1], drop_prob=0.5, training=True))
    ref = drop_path_reference(x, keys[1], drop_prob=0.5, training=True)
    assert out.shape == x.shape and out.dtype == x.dtype
    assert jnp.allclose(out, ref, rtol=1e-6, atol=1e-6), float(jnp.max(jnp.abs(out - ref)))

    # Ragged feature count (F = 105): whole-sample-row path, no pad / no slice.
    x2 = jax.random.normal(keys[2], (3, 5, 7, 3), jnp.float32)
    out2 = jax.block_until_ready(drop_path_pallas(x2, keys[3], drop_prob=0.25, training=True))
    ref2 = drop_path_reference(x2, keys[3], drop_prob=0.25, training=True)
    assert jnp.allclose(out2, ref2, rtol=1e-6, atol=1e-6), float(jnp.max(jnp.abs(out2 - ref2)))

    # N == 1, aligned: exercises the megacore split (2 blocks) incl. a partial
    # last block along the sublane axis.
    x3 = jax.random.normal(keys[4], (1, 24, 128), jnp.float32)
    out3 = jax.block_until_ready(drop_path_pallas(x3, keys[5], drop_prob=0.3, training=True))
    ref3 = drop_path_reference(x3, keys[5], drop_prob=0.3, training=True)
    assert jnp.allclose(out3, ref3, rtol=1e-6, atol=1e-6), float(jnp.max(jnp.abs(out3 - ref3)))

    # bf16: dtype-aware sublane rounding (pack=16) and native bf16 multiply.
    xb = jax.random.normal(keys[6], (2, 8, 16, 16), jnp.float32).astype(jnp.bfloat16)
    outb = jax.block_until_ready(drop_path_pallas(xb, keys[7], drop_prob=0.5, training=True))
    refb = drop_path_reference(xb, keys[7], drop_prob=0.5, training=True)
    assert outb.dtype == jnp.bfloat16
    assert jnp.allclose(outb.astype(jnp.float32), refb.astype(jnp.float32), atol=2e-2)

    # Identity paths (eval mode / drop_prob == 0) return x unchanged, as in PyTorch.
    assert drop_path_pallas(x, keys[1], drop_prob=0.5, training=False) is x
    assert drop_path_pallas(x, keys[1], drop_prob=0.0, training=True) is x

    print("KERNEL_OK")
</pallas_src>

<mosaic_0001>
module attributes {stable_mosaic.version = 11 : i64} {
  func.func @_drop_path_kernel(%arg0: i32, %arg1: i32, %arg2: memref<2xf32, #tpu.memory_space<smem>>, %arg3: memref<1x8x128xf32, #tpu.memory_space<vmem>>, %arg4: memref<1x8x128xf32, #tpu.memory_space<vmem>>) attributes {dimension_semantics = [#tpu.dimension_semantics<parallel>, #tpu.dimension_semantics<parallel>], iteration_bounds = array<i64: 2, 1>, scalar_prefetch = 1 : i64, scratch_operands = 0 : i64, tpu.core_type = #tpu.core_type<tc>, window_params = [{transform_indices = @transform_0, window_bounds = array<i64: 1, 8, 128>}, {transform_indices = @transform_1, window_bounds = array<i64: 1, 8, 128>}]} {
    %0 = arith.index_cast %arg0 : i32 to index
    %1 = memref.load %arg2[%0] : memref<2xf32, #tpu.memory_space<smem>>
    %c0 = arith.constant 0 : index
    %c0_0 = arith.constant 0 : index
    %c0_1 = arith.constant 0 : index
    %2 = vector.load %arg3[%c0, %c0_0, %c0_1] : memref<1x8x128xf32, #tpu.memory_space<vmem>>, vector<1x8x128xf32>
    %3 = vector.broadcast %1 : f32 to vector<1x8x128xf32>
    %4 = arith.mulf %2, %3 : vector<1x8x128xf32>
    %c0_2 = arith.constant 0 : index
    %c0_3 = arith.constant 0 : index
    %c0_4 = arith.constant 0 : index
    %5 = vector.load %arg4[%c0_2, %c0_3, %c0_4] : memref<1x8x128xf32, #tpu.memory_space<vmem>>, vector<1x8x128xf32>
    tpu.vector_store %arg4[%c0_2, %c0_3, %c0_4], %4 {strides = array<i32>} : memref<1x8x128xf32, #tpu.memory_space<vmem>>, vector<1x8x128xf32>,
    return
  }
  func.func @transform_0(%arg0: i32, %arg1: i32, %arg2: memref<2xf32, #tpu.memory_space<smem>>) -> (i32, i32, i32) {
    %c0_i32 = arith.constant 0 : i32
    %c0_i32_0 = arith.constant 0 : i32
    return %arg0, %arg1, %c0_i32 : i32, i32, i32
  }
  func.func @transform_1(%arg0: i32, %arg1: i32, %arg2: memref<2xf32, #tpu.memory_space<smem>>) -> (i32, i32, i32) {
    %c0_i32 = arith.constant 0 : i32
    %c0_i32_0 = arith.constant 0 : i32
    return %arg0, %arg1, %c0_i32 : i32, i32, i32
  }
}

</mosaic_0001>

<bundles_post_ra>
// kernel: tpu_custom_call.1
= control target key start
LH: loop header
LB: loop body
LE: loop exit
PB: predicated region body
PF: predicated region fallthrough
CT: control target
= control target key end

     0   :  { %s450_s9 = smov [#allocation3]   ;;  %s606_s0 = inlined_call_operand.hbm [shape: f32[2], index: 0, kind: input, shape index: {}]   ;;  %s607_s1 = inlined_call_operand.hbm [shape: f32[2,8,128], index: 1, kind: input, shape index: {}]   ;;  %s608_s2 = inlined_call_operand.hbm [shape: f32[2,8,128], index: 2, kind: output, shape index: {}]  }
   0x1   :  { %8 = dma.hbm_to_smem %s606_s0, 16, %s450_s9, [#allocation2] }
   0x2   :  { %416 = dma.done.wait [#allocation2], 16 }
   0x3   :  { %417 = vsyncadd [#allocation2], 4294967280 }
   0x4   :  { %10 = sfence }
   0x5   :  { %11 = vsyncpa [#allocation5], 0 }
   0x6   :  { %13 = vsyncpa [#allocation5 + $0x1], 0 }
   0x7   :  { %14 = vsyncpa [#allocation6], 0 }
   0x8   :  { %16 = vsyncpa [#allocation6 + $0x1], 0  ;;  %s471_s12 = smov 0   ;;  %s473_s13 = smov 0  }
   0x9   :  { %s475_s14 = smov 0   ;;  %s477_s15 = smov 0  }
   0xa   :  { %s479_s16 = smov 0   ;;  %s481_s17 = smov 0  }
   0xb LB: > { %s254_s0 = sadd.s32 4294967295, %s448_s17   ;;  %s255_s18 = sadd.s32 4294967294, %s448_s17   ;;  %s448_s17 = sphi %s481_s17, %s22_s17   ;;  %s444_s16 = sphi %s479_s16, %s620_s16   ;;  %s440_s15 = sphi %s477_s15, %s619_s15   ;;  %s436_s14 = sphi %s475_s14, %s618_s14   ;;  %s432_s13 = sphi %s473_s13, %s617_s13   ;;  %s428_s12 = sphi %s471_s12, %s616_s12  }
   0xc   : > { %s34_s19 = sadd.s32 1, %s444_s16  ;;  %s43_s20 = sadd.s32 1, %s436_s14 }
   0xd   : > { %p36_p0 = scmp.ge.s32.totalorder %s34_s19, 2  ;;  %p50_p1 = scmp.ne.s32.totalorder %s436_s14, %s432_s13 }
   0xe   : > { %p51_p2 = scmp.eq.s32.totalorder %s448_s17, 0  ;;  %p56_p3 = scmp.ne.s32.totalorder %s432_s13, %s428_s12 }
   0xf   : > { %s622_s19 = smov (%p36_p0, %s34_s19), 0  ;;  %p57_p5 = scmp.eq.s32.totalorder %s254_s0, 0 }
  0x10   : > { %p512_p4 = por %p51_p2, %p50_p1  ;;  %s38_s22 = ssub.s32 %s444_s16, %s622_s19 }
  0x11   : > { %p82_p6 = scmp.eq.s32.totalorder %s254_s0, 1  ;;  %p41_p7 = scmp.eq.s32.totalorder %s38_s22, 0 }
  0x12   : > { %p518_p8 = por %p57_p5, %p56_p3  ;;  %p88_p10 = scmp.eq.s32.totalorder %s255_s18, 1 }
  0x13   : > { %p522_p9 = por %p82_p6, %p50_p1  ;;  %p279_p13 = scmp.lt.s32.totalorder %s448_s17, 2 }
  0x14   : > { %s527_s25 = scalar_select %p41_p7, %s436_s14, %s43_s20  }
  0x15   : > { %p529_p11 = por %p88_p10, %p56_p3  ;;  %s108_s27 = sand.u32 1, %s436_s14  }
  0x16   : > { %s258_s28 = sshll.u32 %s108_s27, 3  ;;  %s259_s29 = sshll.u32 %s444_s16, 7 }
  0x17   : > { %s612_s26 = scalar_select %p529_p11, 1, 0 }
  0x18   : > { %s118_s4 = scalar_lea.hbm %s607_s1, %s259_s29  ;;  %s112_s5 = scalar_lea.vmem [#allocation4], %s258_s28 }
  0x19   : > { %s120_s6 = sshll.u32 %s112_s5, 4  ;;  %p542_p0 = pnand %p279_p13, %p512_p4  ;;  %s121_s6 = int_to_ptr.vmem [resolvable:$true] %s120_s6 }
  0x1a   : > { %p260_p1 = scmp.ge.s32.totalorder %s448_s17, 1  ;;  %p125_p2 = scmp.lt.s32.totalorder %s448_s17, 3 }
  0x1b   : > { %s109_s8 = scalar_lea.sflag [#allocation5], %s108_s27  ;;  %p340_p3 = pneg %p542_p0 }
  0x1c   : > { %s351_s9 = scalar_lea.vmem %s121_s6, 128  ;;  %s451_s10 = smov [#allocation4]  }
  0x1d   : > { %p352_p5 = scmp.ne.s32.totalorder %s121_s6, %s351_s9  ;;  %s356_s11 = sshll.u32 %s451_s10, 4  ;;  %s357_s11 = int_to_ptr.vmem [resolvable:$false] %s356_s11 }
  0x1e   : > { %s358_s0 = scalar_lea.vmem %s357_s11, 256  ;;  %p359_p10 = scmp.lt.s32.totalorder %s121_s6, %s357_s11 }
  0x1f   : > { %p354_p6 = pnand %p352_p5, %p340_p3  ;;  %p360_p12 = scmp.lt.s32.totalorder %s358_s0, %s351_s9 }
  0x21   : > { %p355_p7 = pneg %p354_p6  ;;  %p361_p4 = por %p360_p12, %p359_p10 }
  0x23   : > { %p362_p13 = pnand %p361_p4, %p355_p7 }
  0x25   : > { %365 = shalt.err (!%p362_p13)
}
  0x26   : > { %274 = dma.hbm_to_vmem [thread:$0]  (!%p542_p0), %s118_s4, 128, %s121_s6, %s109_s8  }
  0x27   : > { %p126_p11 = pnand %p260_p1, %p125_p2 }
  0x28   : > { %s557_s18 = sand.u32 (!%p126_p11), 1, %s432_s13  }
  0x29   : > { %129 = sbr.rel (%p126_p11) target bundleno = 71 (0x47), region = 24  ;;  %s261_s20 = sshll.u32 (!%p126_p11), %s557_s18, 3 }
  0x2a   : > { %s132_s21 = scalar_lea.sflag (!%p126_p11), [#allocation5], %s557_s18  ;;  %s135_s22 = scalar_lea.vmem (!%p126_p11), [#allocation4], %s261_s20 }
  0x2e   : > { %419 = dma.done.wait (%p518_p8), %s132_s21, 128  }
  0x2f   : > { %421 = vsyncadd (%p518_p8), %s132_s21, 4294967168  ;;  %s154_s27 = sld [smem:[#allocation3 + %s440_s15]]  ;;  %s153_s28 = scalar_lea.vmem [#allocation7], %s261_s20  ;;  %v155_v0 = vld [vmem:[%s135_s22] sm:$0xff] }
  0x30   : > { %s174_s29 = sshll.u32 %s153_s28, 4  ;;  %s264_s30 = sshll.u32 %s440_s15, 7  ;;  %s175_s29 = int_to_ptr.vmem [resolvable:$true] %s174_s29 }
  0x31   : > { %s172_s5 = scalar_lea.hbm %s608_s2, %s264_s30  ;;  %s160_s6 = scalar_lea.sflag [#allocation6], %s557_s18 }
  0x32   : > { %s366_s23 = scalar_lea.vmem %s175_s29, 128  ;;  %s452_s7 = smov [#allocation7]  }
  0x33   : > { %p367_p8 = scmp.ne.s32.totalorder %s175_s29, %s366_s23  ;;  %s370_s8 = sshll.u32 %s452_s7, 4  ;;  %s371_s8 = int_to_ptr.vmem [resolvable:$false] %s370_s8 }
  0x34   : > { %s372_s9 = scalar_lea.vmem %s371_s8, 256  ;;  %p373_p0 = scmp.lt.s32.totalorder %s175_s29, %s371_s8 }
  0x35   : > { %v156_v1 = vstv %s154_s27  ;;  %p368_p11 = pnand %p367_p8, %p522_p9  ;;  %p374_p1 = scmp.lt.s32.totalorder %s372_s9, %s366_s23 }
  0x36   : > { %v157_v2 = vmul.f32 %v156_v1, %v155_v0 }
  0x37   : > { %p369_p12 = pneg %p368_p11  ;;  %p375_p2 = por %p374_p1, %p373_p0 }
  0x38   : > { %158 = vst [vmem:[%s153_s28] sm:$0xff] %v157_v2 }
  0x39   : > { %p376_p3 = pnand %p375_p2, %p369_p12 }
  0x3b   : > { %379 = shalt.err (!%p376_p3)
}
  0x3c   : > { %s380_s15 = scalar_lea.hbm %s172_s5, 128  ;;  %s384_s0 = scalar_lea.hbm %s608_s2, 256 }
  0x3d   : > { %p381_p5 = scmp.ne.s32.totalorder %s172_s5, %s380_s15  ;;  %p385_p10 = scmp.lt.s32.totalorder %s172_s5, %s608_s2 }
  0x3e   : > { %p386_p4 = scmp.lt.s32.totalorder %s384_s0, %s380_s15 }
  0x3f   : > { %p382_p6 = pnand %p381_p5, %p522_p9 }
  0x40   : > { %p387_p13 = por %p386_p4, %p385_p10 }
  0x41   : > { %p383_p7 = pneg %p382_p6 }
  0x43   : > { %p388_p8 = pnand %p387_p13, %p383_p7 }
  0x45   : > { %391 = shalt.err (!%p388_p8)
}
  0x46   : > { %269 = dma.vmem_to_hbm [thread:$0]  (%p522_p9), %s175_s29, 128, %s172_s5, %s160_s6  }
  0x47 PF: > { %s186_s21 = sand.u32 1, %s428_s12   ;;  %p614_p11 = scmp.ne.s32.totalorder %s612_s26, 0 }
  0x48   : > { %p615_p12 = scmp.ge.s32.totalorder %s448_s17, 2  ;;  %s187_s22 = scalar_lea.sflag [#allocation6], %s186_s21 }
  0x4a   : > { %p276_p0 = pnand %p615_p12, %p614_p11 }
  0x4c   : > { %p277_p1 = pneg %p276_p0 }
  0x4e   : > { %423 = dma.done.wait (%p277_p1), %s187_s22, 128  }
  0x4f   : > { %425 = vsyncadd (%p277_p1), %s187_s22, 4294967168  ;;  %s22_s17 = sadd.s32 1, %s448_s17   ;;  %s616_s12 = smov %s432_s13 }
  0x50   : > { %p19_p2 = scmp.ge.s32.totalorder %s22_s17, 4   ;;  %s617_s13 = smov %s436_s14 }
  0x51   : > { %s618_s14 = smov %s527_s25  ;;  %s619_s15 = smov %s444_s16 }
  0x52   : > { %s620_s16 = smov %s622_s19  ;;  %21 = sbr.rel (!%p19_p2) target bundleno = 11 (0xb), region = 69 }
  0x57   :  { %192 = vsyncpa [#allocation5], 1 }
  0x58   :  { %194 = vsyncpa [#allocation5 + $0x1], 1 }
  0x59   :  { %195 = vsyncpa [#allocation6], 1 }
  0x5a   :  { %197 = vsyncpa [#allocation6 + $0x1], 1 }

</bundles_post_ra>
